<compile_context>
chip_gen: v5e
topology: v5e:2x2
jax: 0.10.0
libtpu: 0.0.40
codegen_flags: <defaults>
</compile_context>

<pallas_src>
import jax
import jax.numpy as jnp
from jax import lax
from jax.experimental import pallas as pl
from jax.experimental.pallas import tpu as pltpu


def _triplet_loss_kernel(x_ref, wt_ref, lab_ref, loss_ref):
    B = x_ref.shape[0]

    # ---- embeddings = x @ W^T  (single MXU call, lane-dense W) -----------
    # wt_ref is (E, D); contract the last dims of x (B, D) and wt (E, D).
    emb = lax.dot_general(x_ref[...], wt_ref[...],
                          (((1,), (1,)), ((), ())),
                          preferred_element_type=jnp.float32)        # (B, E)

    # ---- pairwise euclidean distance matrix (one fused MXU contraction) --
    #   dist2[i, j] = |e_i|^2 + |e_j|^2 - 2 <e_i, e_j>
    #              = [emb_i, |e_i|^2, 1] . [-2*emb_j, 1, |e_j|^2]
    sq_col = jnp.sum(emb * emb, axis=1, keepdims=True)               # (B, 1)
    ones = jnp.ones((B, 1), jnp.float32)
    a_mat = jnp.concatenate([emb, sq_col, ones], axis=1)             # (B, E+2)
    r_mat = jnp.concatenate([-2.0 * emb, ones, sq_col], axis=1)      # (B, E+2)
    dist2 = lax.dot_general(a_mat, r_mat, (((1,), (1,)), ((), ())),
                            preferred_element_type=jnp.float32)      # (B, B)
    dmat = jnp.sqrt(jnp.maximum(dist2, 0.0) + 1e-16)                 # (B, B)

    # ---- label masks (built from the single SMEM label vector) -----------
    ii = lax.broadcasted_iota(jnp.int32, (B, B), 0)
    jj = lax.broadcasted_iota(jnp.int32, (B, B), 1)
    lab_i = jnp.zeros((B, B), jnp.int32)    # lab_i[r, c] = labels[r]
    lab_j = jnp.zeros((B, B), jnp.int32)    # lab_j[r, c] = labels[c]
    for k in range(B):                      # 2*B tiny VPU selects
        lk = lab_ref[k]
        lab_i = jnp.where(ii == k, lk, lab_i)
        lab_j = jnp.where(jj == k, lk, lab_j)
    labels_equal = lab_i == lab_j
    not_eye = ii != jj
    mask_pos = jnp.logical_and(labels_equal, not_eye)
    mask_neg = jnp.logical_and(jnp.logical_not(labels_equal), not_eye)

    # ---- mu = mu_neg - mu_pos  (torch.no_grad block) ----------------------
    pos_cnt = jnp.sum(mask_pos.astype(jnp.float32))
    neg_cnt = jnp.sum(mask_neg.astype(jnp.float32))
    # NaN if a batch has no positive / negative pairs, matching torch.mean([]).
    mu_pos = jnp.sum(jnp.where(mask_pos, dmat, 0.0)) / pos_cnt
    mu_neg = jnp.sum(jnp.where(mask_neg, dmat, 0.0)) / neg_cnt
    thr = jnp.maximum(mu_neg - mu_pos, 0.0)            # max(mu, 0)

    # ---- triplet reduction: fully unrolled static loop over negative k ----
    # Transposed (j, i) coordinates: t[j, i] = d[k, i] - d[j, i]
    #                                         = d[i, k] - d[i, j] = t_ref[i, j, k]
    # mask_pos is symmetric; lab[i] != lab[k] implies i != k, and since
    # lab[j] == lab[i] it also implies j != k, so distinct-index checks beyond
    # not_eye are unnecessary.  Loop body is pure VPU work on live vregs; the
    # single cross-lane reduce happens once after the loop.
    acc_sum = jnp.zeros((B, B), jnp.float32)
    acc_cnt = jnp.zeros((B, B), jnp.float32)
    for k in range(B):
        lab_k = lab_ref[k]                              # scalar int32 (SMEM)
        row_k = dmat[k:k + 1, :]                        # (1, B) static slice
        t = row_k - dmat                                # (B, B)
        hard = jnp.logical_and(
            mask_pos,
            jnp.logical_and(lab_j != lab_k, t < thr))
        acc_sum = acc_sum + jnp.where(hard, jnp.maximum(t, 0.0), 0.0)
        acc_cnt = acc_cnt + hard.astype(jnp.float32)

    def _sum11(v):  # full reduce to (1, 1): lane reduce then sublane reduce
        return jnp.sum(jnp.sum(v, axis=1, keepdims=True), axis=0, keepdims=True)

    total = _sum11(acc_sum)                             # (1, 1)
    cnt = _sum11(acc_cnt)                               # (1, 1)
    # Exact divide (NaN when no hard triplets, matching the torch reference).
    loss_ref[...] = total / cnt


def triplet_loss_tpu(x, labels, w, b=None):
    """x: (B, 512) f32 features; labels: (B,) int; w: (512, 10); b ignored.

    The bias of nn.Linear(512, 10) is accepted for interface parity but not
    used: pairwise Euclidean distances (and hence the triplet loss) are
    invariant to adding a constant vector to every embedding.
    """
    del b
    E = w.shape[1]
    del E
    wt = jnp.asarray(w, jnp.float32).T            # (E, D): lane-dense layout
    lab = labels.astype(jnp.int32)

    loss = pl.pallas_call(
        _triplet_loss_kernel,
        out_shape=jax.ShapeDtypeStruct((1, 1), jnp.float32),
        in_specs=[
            pl.BlockSpec(memory_space=pltpu.MemorySpace.VMEM),   # x  (B, D)
            pl.BlockSpec(memory_space=pltpu.MemorySpace.VMEM),   # W^T (E, D)
            pl.BlockSpec(memory_space=pltpu.MemorySpace.SMEM),   # labels (B,)
        ],
        out_specs=pl.BlockSpec(memory_space=pltpu.MemorySpace.VMEM),
    )(x.astype(jnp.float32), wt, lab)
    return loss[0, 0]


def _reference(x, labels, w, b):
    """Pure-JAX reproduction of the PyTorch forward (for validation)."""
    emb = x @ w + b
    dot = emb @ emb.T
    sq = jnp.diag(dot)
    d2 = sq[None, :] - 2.0 * dot + sq[:, None]
    d = jnp.sqrt(jnp.maximum(d2, 0.0) + 1e-16)
    B = labels.shape[0]
    eq = labels[None, :] == labels[:, None]
    eye = jnp.eye(B, dtype=bool)
    mask_pos = eq & ~eye
    mask_neg = ~eq & ~eye
    mu_pos = jnp.sum(jnp.where(mask_pos, d, 0.0)) / jnp.sum(mask_pos).astype(jnp.float32)
    mu_neg = jnp.sum(jnp.where(mask_neg, d, 0.0)) / jnp.sum(mask_neg).astype(jnp.float32)
    thr = jnp.maximum(mu_neg - mu_pos, 0.0)
    t = d[:, None, :] - d[:, :, None]                 # t[i,j,k] = d_ik - d_ij
    ne = ~eye
    distinct = ne[:, :, None] & ne[:, None, :] & ne[None, :, :]
    valid = distinct & eq[:, :, None] & ~eq[:, None, :]
    hard = valid & (t < thr)
    return jnp.sum(jnp.where(hard, jnp.maximum(t, 0.0), 0.0)) / \
        jnp.sum(hard).astype(jnp.float32)


if __name__ == "__main__":
    B, D, E = 8, 512, 10
    key = jax.random.PRNGKey(0)
    k_x, k_w, k_b = jax.random.split(key, 3)

    x = jax.random.normal(k_x, (B, D), dtype=jnp.float32)
    labels = jnp.array([0, 0, 1, 1, 2, 2, 3, 3], dtype=jnp.int32)
    # deterministic init of nn.Linear(512, 10): weight (D, E) + bias (E,)
    w = jax.random.normal(k_w, (D, E), dtype=jnp.float32) * 0.02
    b = jax.random.normal(k_b, (E,), dtype=jnp.float32) * 0.01

    loss = jax.block_until_ready(triplet_loss_tpu(x, labels, w, b))
    ref = jax.block_until_ready(_reference(x, labels, w, b))

    # Tolerance covers fp-rounding differences only (exact final divide; bias
    # dropped in-kernel is mathematically exact, rounding-level numerically).
    assert jnp.allclose(loss, ref, atol=1e-5, rtol=1e-3, equal_nan=True), \
        (loss, ref)
    print("KERNEL_OK")
</pallas_src>

<mosaic_0001>
module attributes {stable_mosaic.version = 11 : i64} {
  func.func @_triplet_loss_kernel(%arg0: memref<8x512xf32, #tpu.memory_space<vmem>>, %arg1: memref<10x512xf32, #tpu.memory_space<vmem>>, %arg2: memref<8xi32, #tpu.memory_space<smem>>, %arg3: memref<1x1xf32, #tpu.memory_space<vmem>>) attributes {dimension_semantics = [], scalar_prefetch = 0 : i64, scratch_operands = 0 : i64, tpu.core_type = #tpu.core_type<tc>} {
    %c0 = arith.constant 0 : index
    %c0_0 = arith.constant 0 : index
    %0 = vector.load %arg0[%c0, %c0_0] : memref<8x512xf32, #tpu.memory_space<vmem>>, vector<8x512xf32>
    %c0_1 = arith.constant 0 : index
    %c0_2 = arith.constant 0 : index
    %1 = vector.load %arg1[%c0_1, %c0_2] : memref<10x512xf32, #tpu.memory_space<vmem>>, vector<10x512xf32>
    %cst = arith.constant dense<0.000000e+00> : vector<8x10xf32>
    %2 = tpu.matmul %0, %1, %cst {dimension_numbers = #tpu.dot_dimension_numbers<[1], [1], [0], [0], [0, 0, 1, 0], [], []>} : vector<8x512xf32>, vector<10x512xf32>, vector<8x10xf32> -> vector<8x10xf32>
    %3 = arith.mulf %2, %2 : vector<8x10xf32>
    %cst_3 = arith.constant dense<0.000000e+00> : vector<8xf32>
    %4 = vector.multi_reduction <add>, %3, %cst_3 [1] : vector<8x10xf32> to vector<8xf32>
    %5 = vector.shape_cast %4 : vector<8xf32> to vector<8x1xf32>
    %cst_4 = arith.constant 1.000000e+00 : f32
    %6 = vector.broadcast %cst_4 : f32 to vector<8x1xf32>
    %7 = tpu.concatenate %2, %5, %6 in 1 : vector<8x10xf32>, vector<8x1xf32>, vector<8x1xf32> -> vector<8x12xf32>
    %cst_5 = arith.constant -2.000000e+00 : f32
    %8 = vector.broadcast %cst_5 : f32 to vector<8x10xf32>
    %9 = arith.mulf %8, %2 : vector<8x10xf32>
    %10 = tpu.concatenate %9, %6, %5 in 1 : vector<8x10xf32>, vector<8x1xf32>, vector<8x1xf32> -> vector<8x12xf32>
    %cst_6 = arith.constant dense<0.000000e+00> : vector<8x8xf32>
    %11 = tpu.matmul %7, %10, %cst_6 {dimension_numbers = #tpu.dot_dimension_numbers<[1], [1], [0], [0], [0, 0, 1, 0], [], []>} : vector<8x12xf32>, vector<8x12xf32>, vector<8x8xf32> -> vector<8x8xf32>
    %cst_7 = arith.constant 0.000000e+00 : f32
    %12 = vector.broadcast %cst_7 : f32 to vector<8x8xf32>
    %13 = arith.maximumf %11, %12 : vector<8x8xf32>
    %cst_8 = arith.constant 1.000000e-16 : f32
    %14 = vector.broadcast %cst_8 : f32 to vector<8x8xf32>
    %15 = arith.addf %13, %14 : vector<8x8xf32>
    %16 = math.sqrt %15 : vector<8x8xf32>
    %17 = tpu.iota {dimensions = array<i32: 0>} : vector<8x8xi32>
    %18 = tpu.iota {dimensions = array<i32: 1>} : vector<8x8xi32>
    %c0_i32 = arith.constant 0 : i32
    %19 = vector.broadcast %c0_i32 : i32 to vector<8x8xi32>
    %c0_i32_9 = arith.constant 0 : i32
    %20 = vector.broadcast %c0_i32_9 : i32 to vector<8x8xi32>
    %c0_10 = arith.constant 0 : index
    %21 = memref.load %arg2[%c0_10] : memref<8xi32, #tpu.memory_space<smem>>
    %c0_i32_11 = arith.constant 0 : i32
    %22 = vector.broadcast %c0_i32_11 : i32 to vector<8x8xi32>
    %23 = arith.cmpi eq, %17, %22 : vector<8x8xi32>
    %24 = vector.broadcast %21 : i32 to vector<8x8xi32>
    %25 = arith.select %23, %24, %19 : vector<8x8xi1>, vector<8x8xi32>
    %c0_i32_12 = arith.constant 0 : i32
    %26 = vector.broadcast %c0_i32_12 : i32 to vector<8x8xi32>
    %27 = arith.cmpi eq, %18, %26 : vector<8x8xi32>
    %28 = vector.broadcast %21 : i32 to vector<8x8xi32>
    %29 = arith.select %27, %28, %20 : vector<8x8xi1>, vector<8x8xi32>
    %c1 = arith.constant 1 : index
    %30 = memref.load %arg2[%c1] : memref<8xi32, #tpu.memory_space<smem>>
    %c1_i32 = arith.constant 1 : i32
    %31 = vector.broadcast %c1_i32 : i32 to vector<8x8xi32>
    %32 = arith.cmpi eq, %17, %31 : vector<8x8xi32>
    %33 = vector.broadcast %30 : i32 to vector<8x8xi32>
    %34 = arith.select %32, %33, %25 : vector<8x8xi1>, vector<8x8xi32>
    %c1_i32_13 = arith.constant 1 : i32
    %35 = vector.broadcast %c1_i32_13 : i32 to vector<8x8xi32>
    %36 = arith.cmpi eq, %18, %35 : vector<8x8xi32>
    %37 = vector.broadcast %30 : i32 to vector<8x8xi32>
    %38 = arith.select %36, %37, %29 : vector<8x8xi1>, vector<8x8xi32>
    %c2 = arith.constant 2 : index
    %39 = memref.load %arg2[%c2] : memref<8xi32, #tpu.memory_space<smem>>
    %c2_i32 = arith.constant 2 : i32
    %40 = vector.broadcast %c2_i32 : i32 to vector<8x8xi32>
    %41 = arith.cmpi eq, %17, %40 : vector<8x8xi32>
    %42 = vector.broadcast %39 : i32 to vector<8x8xi32>
    %43 = arith.select %41, %42, %34 : vector<8x8xi1>, vector<8x8xi32>
    %c2_i32_14 = arith.constant 2 : i32
    %44 = vector.broadcast %c2_i32_14 : i32 to vector<8x8xi32>
    %45 = arith.cmpi eq, %18, %44 : vector<8x8xi32>
    %46 = vector.broadcast %39 : i32 to vector<8x8xi32>
    %47 = arith.select %45, %46, %38 : vector<8x8xi1>, vector<8x8xi32>
    %c3 = arith.constant 3 : index
    %48 = memref.load %arg2[%c3] : memref<8xi32, #tpu.memory_space<smem>>
    %c3_i32 = arith.constant 3 : i32
    %49 = vector.broadcast %c3_i32 : i32 to vector<8x8xi32>
    %50 = arith.cmpi eq, %17, %49 : vector<8x8xi32>
    %51 = vector.broadcast %48 : i32 to vector<8x8xi32>
    %52 = arith.select %50, %51, %43 : vector<8x8xi1>, vector<8x8xi32>
    %c3_i32_15 = arith.constant 3 : i32
    %53 = vector.broadcast %c3_i32_15 : i32 to vector<8x8xi32>
    %54 = arith.cmpi eq, %18, %53 : vector<8x8xi32>
    %55 = vector.broadcast %48 : i32 to vector<8x8xi32>
    %56 = arith.select %54, %55, %47 : vector<8x8xi1>, vector<8x8xi32>
    %c4 = arith.constant 4 : index
    %57 = memref.load %arg2[%c4] : memref<8xi32, #tpu.memory_space<smem>>
    %c4_i32 = arith.constant 4 : i32
    %58 = vector.broadcast %c4_i32 : i32 to vector<8x8xi32>
    %59 = arith.cmpi eq, %17, %58 : vector<8x8xi32>
    %60 = vector.broadcast %57 : i32 to vector<8x8xi32>
    %61 = arith.select %59, %60, %52 : vector<8x8xi1>, vector<8x8xi32>
    %c4_i32_16 = arith.constant 4 : i32
    %62 = vector.broadcast %c4_i32_16 : i32 to vector<8x8xi32>
    %63 = arith.cmpi eq, %18, %62 : vector<8x8xi32>
    %64 = vector.broadcast %57 : i32 to vector<8x8xi32>
    %65 = arith.select %63, %64, %56 : vector<8x8xi1>, vector<8x8xi32>
    %c5 = arith.constant 5 : index
    %66 = memref.load %arg2[%c5] : memref<8xi32, #tpu.memory_space<smem>>
    %c5_i32 = arith.constant 5 : i32
    %67 = vector.broadcast %c5_i32 : i32 to vector<8x8xi32>
    %68 = arith.cmpi eq, %17, %67 : vector<8x8xi32>
    %69 = vector.broadcast %66 : i32 to vector<8x8xi32>
    %70 = arith.select %68, %69, %61 : vector<8x8xi1>, vector<8x8xi32>
    %c5_i32_17 = arith.constant 5 : i32
    %71 = vector.broadcast %c5_i32_17 : i32 to vector<8x8xi32>
    %72 = arith.cmpi eq, %18, %71 : vector<8x8xi32>
    %73 = vector.broadcast %66 : i32 to vector<8x8xi32>
    %74 = arith.select %72, %73, %65 : vector<8x8xi1>, vector<8x8xi32>
    %c6 = arith.constant 6 : index
    %75 = memref.load %arg2[%c6] : memref<8xi32, #tpu.memory_space<smem>>
    %c6_i32 = arith.constant 6 : i32
    %76 = vector.broadcast %c6_i32 : i32 to vector<8x8xi32>
    %77 = arith.cmpi eq, %17, %76 : vector<8x8xi32>
    %78 = vector.broadcast %75 : i32 to vector<8x8xi32>
    %79 = arith.select %77, %78, %70 : vector<8x8xi1>, vector<8x8xi32>
    %c6_i32_18 = arith.constant 6 : i32
    %80 = vector.broadcast %c6_i32_18 : i32 to vector<8x8xi32>
    %81 = arith.cmpi eq, %18, %80 : vector<8x8xi32>
    %82 = vector.broadcast %75 : i32 to vector<8x8xi32>
    %83 = arith.select %81, %82, %74 : vector<8x8xi1>, vector<8x8xi32>
    %c7 = arith.constant 7 : index
    %84 = memref.load %arg2[%c7] : memref<8xi32, #tpu.memory_space<smem>>
    %c7_i32 = arith.constant 7 : i32
    %85 = vector.broadcast %c7_i32 : i32 to vector<8x8xi32>
    %86 = arith.cmpi eq, %17, %85 : vector<8x8xi32>
    %87 = vector.broadcast %84 : i32 to vector<8x8xi32>
    %88 = arith.select %86, %87, %79 : vector<8x8xi1>, vector<8x8xi32>
    %c7_i32_19 = arith.constant 7 : i32
    %89 = vector.broadcast %c7_i32_19 : i32 to vector<8x8xi32>
    %90 = arith.cmpi eq, %18, %89 : vector<8x8xi32>
    %91 = vector.broadcast %84 : i32 to vector<8x8xi32>
    %92 = arith.select %90, %91, %83 : vector<8x8xi1>, vector<8x8xi32>
    %93 = arith.cmpi eq, %88, %92 : vector<8x8xi32>
    %94 = arith.cmpi ne, %17, %18 : vector<8x8xi32>
    %95 = arith.andi %93, %94 : vector<8x8xi1>
    %cst_20 = arith.constant dense<true> : vector<8x8xi1>
    %96 = arith.xori %93, %cst_20 : vector<8x8xi1>
    %97 = arith.andi %96, %94 : vector<8x8xi1>
    %98 = arith.extui %95 : vector<8x8xi1> to vector<8x8xi32>
    %99 = arith.sitofp %98 : vector<8x8xi32> to vector<8x8xf32>
    %100 = vector.shape_cast %99 : vector<8x8xf32> to vector<1x8x8xf32>
    %cst_21 = arith.constant dense<0.000000e+00> : vector<1xf32>
    %101 = vector.multi_reduction <add>, %100, %cst_21 [1, 2] : vector<1x8x8xf32> to vector<1xf32>
    %102 = vector.shape_cast %101 : vector<1xf32> to vector<1x1x1xf32>
    %103 = vector.extract %102[0, 0, 0] : f32 from vector<1x1x1xf32>
    %104 = arith.extui %97 : vector<8x8xi1> to vector<8x8xi32>
    %105 = arith.sitofp %104 : vector<8x8xi32> to vector<8x8xf32>
    %106 = vector.shape_cast %105 : vector<8x8xf32> to vector<1x8x8xf32>
    %cst_22 = arith.constant dense<0.000000e+00> : vector<1xf32>
    %107 = vector.multi_reduction <add>, %106, %cst_22 [1, 2] : vector<1x8x8xf32> to vector<1xf32>
    %108 = vector.shape_cast %107 : vector<1xf32> to vector<1x1x1xf32>
    %109 = vector.extract %108[0, 0, 0] : f32 from vector<1x1x1xf32>
    %cst_23 = arith.constant 0.000000e+00 : f32
    %110 = vector.broadcast %cst_23 : f32 to vector<8x8xf32>
    %111 = arith.select %95, %16, %110 : vector<8x8xi1>, vector<8x8xf32>
    %112 = vector.shape_cast %111 : vector<8x8xf32> to vector<1x8x8xf32>
    %cst_24 = arith.constant dense<0.000000e+00> : vector<1xf32>
    %113 = vector.multi_reduction <add>, %112, %cst_24 [1, 2] : vector<1x8x8xf32> to vector<1xf32>
    %114 = vector.shape_cast %113 : vector<1xf32> to vector<1x1x1xf32>
    %115 = vector.extract %114[0, 0, 0] : f32 from vector<1x1x1xf32>
    %116 = arith.divf %115, %103 : f32
    %cst_25 = arith.constant 0.000000e+00 : f32
    %117 = vector.broadcast %cst_25 : f32 to vector<8x8xf32>
    %118 = arith.select %97, %16, %117 : vector<8x8xi1>, vector<8x8xf32>
    %119 = vector.shape_cast %118 : vector<8x8xf32> to vector<1x8x8xf32>
    %cst_26 = arith.constant dense<0.000000e+00> : vector<1xf32>
    %120 = vector.multi_reduction <add>, %119, %cst_26 [1, 2] : vector<1x8x8xf32> to vector<1xf32>
    %121 = vector.shape_cast %120 : vector<1xf32> to vector<1x1x1xf32>
    %122 = vector.extract %121[0, 0, 0] : f32 from vector<1x1x1xf32>
    %123 = arith.divf %122, %109 : f32
    %124 = arith.subf %123, %116 : f32
    %cst_27 = arith.constant 0.000000e+00 : f32
    %125 = arith.maximumf %124, %cst_27 : f32
    %cst_28 = arith.constant 0.000000e+00 : f32
    %126 = vector.broadcast %cst_28 : f32 to vector<8x8xf32>
    %cst_29 = arith.constant 0.000000e+00 : f32
    %127 = vector.broadcast %cst_29 : f32 to vector<8x8xf32>
    %c0_30 = arith.constant 0 : index
    %128 = memref.load %arg2[%c0_30] : memref<8xi32, #tpu.memory_space<smem>>
    %129 = vector.extract_strided_slice %16 {offsets = [0, 0], sizes = [1, 8], strides = [1, 1]} : vector<8x8xf32> to vector<1x8xf32>
    %130 = vector.broadcast %129 : vector<1x8xf32> to vector<8x8xf32>
    %131 = arith.subf %130, %16 : vector<8x8xf32>
    %132 = vector.broadcast %128 : i32 to vector<8x8xi32>
    %133 = arith.cmpi ne, %92, %132 : vector<8x8xi32>
    %134 = vector.broadcast %125 : f32 to vector<8x8xf32>
    %135 = arith.cmpf olt, %131, %134 : vector<8x8xf32>
    %136 = arith.andi %133, %135 : vector<8x8xi1>
    %137 = arith.andi %95, %136 : vector<8x8xi1>
    %cst_31 = arith.constant 0.000000e+00 : f32
    %138 = vector.broadcast %cst_31 : f32 to vector<8x8xf32>
    %139 = arith.maximumf %131, %138 : vector<8x8xf32>
    %cst_32 = arith.constant 0.000000e+00 : f32
    %140 = vector.broadcast %cst_32 : f32 to vector<8x8xf32>
    %141 = arith.select %137, %139, %140 : vector<8x8xi1>, vector<8x8xf32>
    %142 = arith.addf %126, %141 : vector<8x8xf32>
    %143 = arith.extui %137 : vector<8x8xi1> to vector<8x8xi32>
    %144 = arith.sitofp %143 : vector<8x8xi32> to vector<8x8xf32>
    %145 = arith.addf %127, %144 : vector<8x8xf32>
    %c1_33 = arith.constant 1 : index
    %146 = memref.load %arg2[%c1_33] : memref<8xi32, #tpu.memory_space<smem>>
    %147 = vector.extract_strided_slice %16 {offsets = [1, 0], sizes = [1, 8], strides = [1, 1]} : vector<8x8xf32> to vector<1x8xf32>
    %148 = vector.broadcast %147 : vector<1x8xf32> to vector<8x8xf32>
    %149 = arith.subf %148, %16 : vector<8x8xf32>
    %150 = vector.broadcast %146 : i32 to vector<8x8xi32>
    %151 = arith.cmpi ne, %92, %150 : vector<8x8xi32>
    %152 = vector.broadcast %125 : f32 to vector<8x8xf32>
    %153 = arith.cmpf olt, %149, %152 : vector<8x8xf32>
    %154 = arith.andi %151, %153 : vector<8x8xi1>
    %155 = arith.andi %95, %154 : vector<8x8xi1>
    %cst_34 = arith.constant 0.000000e+00 : f32
    %156 = vector.broadcast %cst_34 : f32 to vector<8x8xf32>
    %157 = arith.maximumf %149, %156 : vector<8x8xf32>
    %cst_35 = arith.constant 0.000000e+00 : f32
    %158 = vector.broadcast %cst_35 : f32 to vector<8x8xf32>
    %159 = arith.select %155, %157, %158 : vector<8x8xi1>, vector<8x8xf32>
    %160 = arith.addf %142, %159 : vector<8x8xf32>
    %161 = arith.extui %155 : vector<8x8xi1> to vector<8x8xi32>
    %162 = arith.sitofp %161 : vector<8x8xi32> to vector<8x8xf32>
    %163 = arith.addf %145, %162 : vector<8x8xf32>
    %c2_36 = arith.constant 2 : index
    %164 = memref.load %arg2[%c2_36] : memref<8xi32, #tpu.memory_space<smem>>
    %165 = vector.extract_strided_slice %16 {offsets = [2, 0], sizes = [1, 8], strides = [1, 1]} : vector<8x8xf32> to vector<1x8xf32>
    %166 = vector.broadcast %165 : vector<1x8xf32> to vector<8x8xf32>
    %167 = arith.subf %166, %16 : vector<8x8xf32>
    %168 = vector.broadcast %164 : i32 to vector<8x8xi32>
    %169 = arith.cmpi ne, %92, %168 : vector<8x8xi32>
    %170 = vector.broadcast %125 : f32 to vector<8x8xf32>
    %171 = arith.cmpf olt, %167, %170 : vector<8x8xf32>
    %172 = arith.andi %169, %171 : vector<8x8xi1>
    %173 = arith.andi %95, %172 : vector<8x8xi1>
    %cst_37 = arith.constant 0.000000e+00 : f32
    %174 = vector.broadcast %cst_37 : f32 to vector<8x8xf32>
    %175 = arith.maximumf %167, %174 : vector<8x8xf32>
    %cst_38 = arith.constant 0.000000e+00 : f32
    %176 = vector.broadcast %cst_38 : f32 to vector<8x8xf32>
    %177 = arith.select %173, %175, %176 : vector<8x8xi1>, vector<8x8xf32>
    %178 = arith.addf %160, %177 : vector<8x8xf32>
    %179 = arith.extui %173 : vector<8x8xi1> to vector<8x8xi32>
    %180 = arith.sitofp %179 : vector<8x8xi32> to vector<8x8xf32>
    %181 = arith.addf %163, %180 : vector<8x8xf32>
    %c3_39 = arith.constant 3 : index
    %182 = memref.load %arg2[%c3_39] : memref<8xi32, #tpu.memory_space<smem>>
    %183 = vector.extract_strided_slice %16 {offsets = [3, 0], sizes = [1, 8], strides = [1, 1]} : vector<8x8xf32> to vector<1x8xf32>
    %184 = vector.broadcast %183 : vector<1x8xf32> to vector<8x8xf32>
    %185 = arith.subf %184, %16 : vector<8x8xf32>
    %186 = vector.broadcast %182 : i32 to vector<8x8xi32>
    %187 = arith.cmpi ne, %92, %186 : vector<8x8xi32>
    %188 = vector.broadcast %125 : f32 to vector<8x8xf32>
    %189 = arith.cmpf olt, %185, %188 : vector<8x8xf32>
    %190 = arith.andi %187, %189 : vector<8x8xi1>
    %191 = arith.andi %95, %190 : vector<8x8xi1>
    %cst_40 = arith.constant 0.000000e+00 : f32
    %192 = vector.broadcast %cst_40 : f32 to vector<8x8xf32>
    %193 = arith.maximumf %185, %192 : vector<8x8xf32>
    %cst_41 = arith.constant 0.000000e+00 : f32
    %194 = vector.broadcast %cst_41 : f32 to vector<8x8xf32>
    %195 = arith.select %191, %193, %194 : vector<8x8xi1>, vector<8x8xf32>
    %196 = arith.addf %178, %195 : vector<8x8xf32>
    %197 = arith.extui %191 : vector<8x8xi1> to vector<8x8xi32>
    %198 = arith.sitofp %197 : vector<8x8xi32> to vector<8x8xf32>
    %199 = arith.addf %181, %198 : vector<8x8xf32>
    %c4_42 = arith.constant 4 : index
    %200 = memref.load %arg2[%c4_42] : memref<8xi32, #tpu.memory_space<smem>>
    %201 = vector.extract_strided_slice %16 {offsets = [4, 0], sizes = [1, 8], strides = [1, 1]} : vector<8x8xf32> to vector<1x8xf32>
    %202 = vector.broadcast %201 : vector<1x8xf32> to vector<8x8xf32>
    %203 = arith.subf %202, %16 : vector<8x8xf32>
    %204 = vector.broadcast %200 : i32 to vector<8x8xi32>
    %205 = arith.cmpi ne, %92, %204 : vector<8x8xi32>
    %206 = vector.broadcast %125 : f32 to vector<8x8xf32>
    %207 = arith.cmpf olt, %203, %206 : vector<8x8xf32>
    %208 = arith.andi %205, %207 : vector<8x8xi1>
    %209 = arith.andi %95, %208 : vector<8x8xi1>
    %cst_43 = arith.constant 0.000000e+00 : f32
    %210 = vector.broadcast %cst_43 : f32 to vector<8x8xf32>
    %211 = arith.maximumf %203, %210 : vector<8x8xf32>
    %cst_44 = arith.constant 0.000000e+00 : f32
    %212 = vector.broadcast %cst_44 : f32 to vector<8x8xf32>
    %213 = arith.select %209, %211, %212 : vector<8x8xi1>, vector<8x8xf32>
    %214 = arith.addf %196, %213 : vector<8x8xf32>
    %215 = arith.extui %209 : vector<8x8xi1> to vector<8x8xi32>
    %216 = arith.sitofp %215 : vector<8x8xi32> to vector<8x8xf32>
    %217 = arith.addf %199, %216 : vector<8x8xf32>
    %c5_45 = arith.constant 5 : index
    %218 = memref.load %arg2[%c5_45] : memref<8xi32, #tpu.memory_space<smem>>
    %219 = vector.extract_strided_slice %16 {offsets = [5, 0], sizes = [1, 8], strides = [1, 1]} : vector<8x8xf32> to vector<1x8xf32>
    %220 = vector.broadcast %219 : vector<1x8xf32> to vector<8x8xf32>
    %221 = arith.subf %220, %16 : vector<8x8xf32>
    %222 = vector.broadcast %218 : i32 to vector<8x8xi32>
    %223 = arith.cmpi ne, %92, %222 : vector<8x8xi32>
    %224 = vector.broadcast %125 : f32 to vector<8x8xf32>
    %225 = arith.cmpf olt, %221, %224 : vector<8x8xf32>
    %226 = arith.andi %223, %225 : vector<8x8xi1>
    %227 = arith.andi %95, %226 : vector<8x8xi1>
    %cst_46 = arith.constant 0.000000e+00 : f32
    %228 = vector.broadcast %cst_46 : f32 to vector<8x8xf32>
    %229 = arith.maximumf %221, %228 : vector<8x8xf32>
    %cst_47 = arith.constant 0.000000e+00 : f32
    %230 = vector.broadcast %cst_47 : f32 to vector<8x8xf32>
    %231 = arith.select %227, %229, %230 : vector<8x8xi1>, vector<8x8xf32>
    %232 = arith.addf %214, %231 : vector<8x8xf32>
    %233 = arith.extui %227 : vector<8x8xi1> to vector<8x8xi32>
    %234 = arith.sitofp %233 : vector<8x8xi32> to vector<8x8xf32>
    %235 = arith.addf %217, %234 : vector<8x8xf32>
    %c6_48 = arith.constant 6 : index
    %236 = memref.load %arg2[%c6_48] : memref<8xi32, #tpu.memory_space<smem>>
    %237 = vector.extract_strided_slice %16 {offsets = [6, 0], sizes = [1, 8], strides = [1, 1]} : vector<8x8xf32> to vector<1x8xf32>
    %238 = vector.broadcast %237 : vector<1x8xf32> to vector<8x8xf32>
    %239 = arith.subf %238, %16 : vector<8x8xf32>
    %240 = vector.broadcast %236 : i32 to vector<8x8xi32>
    %241 = arith.cmpi ne, %92, %240 : vector<8x8xi32>
    %242 = vector.broadcast %125 : f32 to vector<8x8xf32>
    %243 = arith.cmpf olt, %239, %242 : vector<8x8xf32>
    %244 = arith.andi %241, %243 : vector<8x8xi1>
    %245 = arith.andi %95, %244 : vector<8x8xi1>
    %cst_49 = arith.constant 0.000000e+00 : f32
    %246 = vector.broadcast %cst_49 : f32 to vector<8x8xf32>
    %247 = arith.maximumf %239, %246 : vector<8x8xf32>
    %cst_50 = arith.constant 0.000000e+00 : f32
    %248 = vector.broadcast %cst_50 : f32 to vector<8x8xf32>
    %249 = arith.select %245, %247, %248 : vector<8x8xi1>, vector<8x8xf32>
    %250 = arith.addf %232, %249 : vector<8x8xf32>
    %251 = arith.extui %245 : vector<8x8xi1> to vector<8x8xi32>
    %252 = arith.sitofp %251 : vector<8x8xi32> to vector<8x8xf32>
    %253 = arith.addf %235, %252 : vector<8x8xf32>
    %c7_51 = arith.constant 7 : index
    %254 = memref.load %arg2[%c7_51] : memref<8xi32, #tpu.memory_space<smem>>
    %255 = vector.extract_strided_slice %16 {offsets = [7, 0], sizes = [1, 8], strides = [1, 1]} : vector<8x8xf32> to vector<1x8xf32>
    %256 = vector.broadcast %255 : vector<1x8xf32> to vector<8x8xf32>
    %257 = arith.subf %256, %16 : vector<8x8xf32>
    %258 = vector.broadcast %254 : i32 to vector<8x8xi32>
    %259 = arith.cmpi ne, %92, %258 : vector<8x8xi32>
    %260 = vector.broadcast %125 : f32 to vector<8x8xf32>
    %261 = arith.cmpf olt, %257, %260 : vector<8x8xf32>
    %262 = arith.andi %259, %261 : vector<8x8xi1>
    %263 = arith.andi %95, %262 : vector<8x8xi1>
    %cst_52 = arith.constant 0.000000e+00 : f32
    %264 = vector.broadcast %cst_52 : f32 to vector<8x8xf32>
    %265 = arith.maximumf %257, %264 : vector<8x8xf32>
    %cst_53 = arith.constant 0.000000e+00 : f32
    %266 = vector.broadcast %cst_53 : f32 to vector<8x8xf32>
    %267 = arith.select %263, %265, %266 : vector<8x8xi1>, vector<8x8xf32>
    %268 = arith.addf %250, %267 : vector<8x8xf32>
    %269 = arith.extui %263 : vector<8x8xi1> to vector<8x8xi32>
    %270 = arith.sitofp %269 : vector<8x8xi32> to vector<8x8xf32>
    %271 = arith.addf %253, %270 : vector<8x8xf32>
    %cst_54 = arith.constant dense<0.000000e+00> : vector<8xf32>
    %272 = vector.multi_reduction <add>, %268, %cst_54 [1] : vector<8x8xf32> to vector<8xf32>
    %273 = vector.shape_cast %272 : vector<8xf32> to vector<8x1xf32>
    %cst_55 = arith.constant dense<0.000000e+00> : vector<1xf32>
    %274 = vector.multi_reduction <add>, %273, %cst_55 [0] : vector<8x1xf32> to vector<1xf32>
    %275 = vector.shape_cast %274 : vector<1xf32> to vector<1x1xf32>
    %cst_56 = arith.constant dense<0.000000e+00> : vector<8xf32>
    %276 = vector.multi_reduction <add>, %271, %cst_56 [1] : vector<8x8xf32> to vector<8xf32>
    %277 = vector.shape_cast %276 : vector<8xf32> to vector<8x1xf32>
    %cst_57 = arith.constant dense<0.000000e+00> : vector<1xf32>
    %278 = vector.multi_reduction <add>, %277, %cst_57 [0] : vector<8x1xf32> to vector<1xf32>
    %279 = vector.shape_cast %278 : vector<1xf32> to vector<1x1xf32>
    %280 = arith.divf %275, %279 : vector<1x1xf32>
    %c0_58 = arith.constant 0 : index
    %c0_59 = arith.constant 0 : index
    %281 = vector.load %arg3[%c0_58, %c0_59] : memref<1x1xf32, #tpu.memory_space<vmem>>, vector<1x1xf32>
    tpu.vector_store %arg3[%c0_58, %c0_59], %280 {strides = array<i32>} : memref<1x1xf32, #tpu.memory_space<vmem>>, vector<1x1xf32>,
    return
  }
}

</mosaic_0001>

<bundles_post_ra>
// kernel: tpu_custom_call.1
= control target key start
LH: loop header
LB: loop body
LE: loop exit
PB: predicated region body
PF: predicated region fallthrough
CT: control target
= control target key end

     0   :  { %8 = vsyncpa [#allocation3], 0  ;;  %s821_s0 = inlined_call_operand.hbm [shape: f32[8,512], index: 0, kind: input, shape index: {}]   ;;  %s822_s1 = inlined_call_operand.hbm [shape: f32[10,512], index: 1, kind: input, shape index: {}]   ;;  %s823_s2 = inlined_call_operand.vmem [shape: s32[8], index: 2, kind: input, shape index: {}]   ;;  %s824_s3 = inlined_call_operand.hbm [shape: f32[1,1], index: 3, kind: output, shape index: {}]  }
   0x1   :  { %9 = vsyncpa [#allocation7], 0 }
   0x2   :  { %10 = vsyncpa [#allocation5], 0 }
   0x3   :  { %11 = vsyncpa [#allocation4], 0  ;;  %s17_s14 = sshll.u32 %s821_s0, 4  ;;  %s633_s15 = smov [#allocation2]   ;;  %s18_s14 = int_to_ptr.hbm [resolvable:$true] %s17_s14 }
   0x4   :  { %s19_s16 = sshll.u32 %s633_s15, 4  ;;  %s27_s19 = sshll.u32 %s822_s1, 4  ;;  %s20_s16 = int_to_ptr.vmem [resolvable:$true] %s19_s16  ;;  %s28_s19 = int_to_ptr.hbm [resolvable:$true] %s27_s19 }
   0x5   :  { %22 = dma.hbm_to_vmem [thread:$0]  %s18_s14, 512, %s20_s16, [#allocation3]  }
   0x6   :  { %s634_s20 = smov [#allocation6]   ;;  %s635_s22 = smov 512  }
   0x7   :  { %s29_s21 = sshll.u32 %s634_s20, 4  ;;  %s636_s23 = smov 32   ;;  %s30_s21 = int_to_ptr.vmem [resolvable:$true] %s29_s21 }
   0x8   :  { %35 = dma.hbm_to_vmem [thread:$0]  %s28_s19, 1024, %s30_s21, [#allocation7], %s635_s22, %s635_s22, %s636_s23  }
   0x9   :  { %s41_s0 = sshll.u32 %s823_s2, 4  ;;  %s637_s26 = smov [#allocation8]   ;;  %s42_s0 = int_to_ptr.vmem [resolvable:$true] %s41_s0 }
   0xa   :  { %44 = dma.vmem_to_smem %s42_s0, 16, %s637_s26, [#allocation5]  }
   0xb   :  { %625 = dma.done.wait [#allocation3], 512  }
   0xc   :  { %626 = vsyncadd [#allocation3], 4294966784 }
   0xd   :  { %627 = dma.done.wait [#allocation7], 1024  }
   0xe   :  { %628 = vsyncadd [#allocation7], 4294966272 }
   0xf   :  { %629 = dma.done.wait [#allocation5], 16  }
  0x10   :  { %630 = vsyncadd [#allocation5], 4294967280 }
  0x11   :  { %57 = sfence }
  0x12   :  { %v68_v0 = vld [vmem:[#allocation6 + $0x30] sm:$0x3]  ;;  %v69_v1 = vld [vmem:[#allocation6 + $0x38] sm:$0x3]  ;;  %v66_v2 = vld [vmem:[#allocation6 + $0x20] sm:$0x3]  ;;  %v202_v21 = vlaneseq }
  0x13   :  { %124 = vmatpush.xpose.msra.mxu2 %v68_v0  ;;  %144 = vmatpush.xpose.msra.mxu3 %v69_v1  ;;  %v67_v3 = vld [vmem:[#allocation6 + $0x28] sm:$0x3]  ;;  %v64_v4 = vld [vmem:[#allocation6 + $0x10] sm:$0xff]  ;;  %v65_v5 = vld [vmem:[#allocation6 + $0x18] sm:$0xff]  ;;  %vm151_vm0 = vcmask 80896   ;;  %s206_s1 = sld [smem:[#allocation8]] }
  0x14   :  { %84 = vmatpush.xpose.msra.mxu0 %v66_v2  ;;  %104 = vmatpush.xpose.msra.mxu1 %v67_v3  ;;  %v62_v6 = vld [vmem:[#allocation6] sm:$0xff]  ;;  %v63_v7 = vld [vmem:[#allocation6 + $0x8] sm:$0xff]  ;;  %v60_v8 = vld [vmem:[#allocation2 + $0x10] sm:$0xff]  ;;  %s495_s2 = sld [smem:[#allocation8 + $0x1]]  ;;  %v203_v24 = vshrl.u32 %v202_v21, 7  ;;  %v205_v25 = vand.u32 127, %v202_v21 }
  0x15   :  { %v61_v9 = vld [vmem:[#allocation2 + $0x18] sm:$0xff]  ;;  %v58_v10 = vld [vmem:[#allocation2] sm:$0xff]  ;;  %v59_v11 = vld [vmem:[#allocation2 + $0x8] sm:$0xff]  ;;  %s496_s27 = sld [smem:[#allocation8 + $0x2]]  ;;  %v639_v49 = vmov 0.0   ;;  %s640_s15 = smov 0.0  }
  0x16   :  { %s497_s28 = sld [smem:[#allocation8 + $0x3]]  ;;  %vm207_vm1 = vcmp.eq.s32.totalorder %v203_v24, 0  ;;  %vm210_vm2 = vcmp.eq.s32.totalorder %v205_v25, 0  ;;  %vm213_vm3 = vcmp.eq.s32.totalorder %v203_v24, 1  ;;  %vm216_vm4 = vcmp.eq.s32.totalorder %v205_v25, 1  ;;  %s641_s17 = smov [#allocation9]  }
  0x17   :  { %125 = vmatpush.xpose.msra.mxu2 %v64_v4  ;;  %145 = vmatpush.xpose.msra.mxu3 %v65_v5  ;;  %s498_s29 = sld [smem:[#allocation8 + $0x4]]  ;;  %vm219_vm5 = vcmp.eq.s32.totalorder %v203_v24, 2  ;;  %vm222_vm6 = vcmp.eq.s32.totalorder %v205_v25, 2  ;;  %vm225_vm7 = vcmp.eq.s32.totalorder %v203_v24, 3  ;;  %vm228_vm8 = vcmp.eq.s32.totalorder %v205_v25, 3  ;;  %s479_s18 = sshll.u32 %s641_s17, 4  ;;  %s480_s18 = int_to_ptr.vmem [resolvable:$true] %s479_s18 }
  0x18   :  { %85 = vmatpush.xpose.msra.mxu0 %v62_v6  ;;  %105 = vmatpush.xpose.msra.mxu1 %v63_v7  ;;  %s499_s30 = sld [smem:[#allocation8 + $0x5]]  ;;  %vm231_vm9 = vcmp.eq.s32.totalorder %v203_v24, 4  ;;  %vm234_vm10 = vcmp.eq.s32.totalorder %v205_v25, 4  ;;  %vm237_vm11 = vcmp.eq.s32.totalorder %v203_v24, 5  ;;  %vm240_vm12 = vcmp.eq.s32.totalorder %v205_v25, 5  ;;  %s481_s21 = sshll.u32 %s824_s3, 4  ;;  %s482_s21 = int_to_ptr.hbm [resolvable:$true] %s481_s21 }
  0x19   :  { %s500_s4 = sld [smem:[#allocation8 + $0x6]]  ;;  %v676_v22 = vstv %s206_s1  ;;  %vm243_vm13 = vcmp.eq.s32.totalorder %v203_v24, 6  ;;  %vm246_vm14 = vcmp.eq.s32.totalorder %v205_v25, 6  ;;  %vm249_vm15 = vcmp.eq.s32.totalorder %v203_v24, 7 }
  0x1a   :  { %126 = vmatmul.f32.vlgmr.msra.gmra.mxu2 %v60_v8  ;;  %146 = vmatmul.f32.vlgmr.msra.gmra.mxu3 %v61_v9  ;;  %s501_s5 = sld [smem:[#allocation8 + $0x7]]  ;;  %v678_v23 = vstv %s495_s2  ;;  %v209_v32 = vsel %vm207_vm1, %v676_v22, 0  ;;  %v211_v33 = vsel %vm210_vm2, %v676_v22, 0  ;;  %vm252_vm1 = vcmp.eq.s32.totalorder %v205_v25, 7 }
  0x1b   :  { %86 = vmatmul.f32.vlgmr.msra.gmra.mxu0 %v58_v10  ;;  %106 = vmatmul.f32.vlgmr.msra.gmra.mxu1 %v59_v11  ;;  %v680_v26 = vstv %s496_s27  ;;  %v215_v34 = vsel %vm213_vm3, %v678_v23, %v209_v32  ;;  %v217_v35 = vsel %vm216_vm4, %v678_v23, %v211_v33  ;;  %vm255_vm2 = vcmp.ne.s32.totalorder %v203_v24, %v205_v25 }
  0x1c   :  { %v682_v27 = vstv %s497_s28  ;;  %v221_v36 = vsel %vm219_vm5, %v680_v26, %v215_v34  ;;  %v223_v37 = vsel %vm222_vm6, %v680_v26, %v217_v35  ;;  %vm638_vm4 = vmmov 1  }
  0x1d   :  { %v684_v28 = vstv %s498_s29  ;;  %v227_v38 = vsel %vm225_vm7, %v682_v27, %v221_v36  ;;  %v229_v39 = vsel %vm228_vm8, %v682_v27, %v223_v37  ;;  %vm261_vm6 = vcmask 64512  }
  0x1e   :  { %v686_v29 = vstv %s499_s30  ;;  %v233_v40 = vsel %vm231_vm9, %v684_v28, %v227_v38  ;;  %v235_v41 = vsel %vm234_vm10, %v684_v28, %v229_v39  ;;  %vm156_vm9 = vcmask 89088  }
  0x1f   :  { %v688_v30 = vstv %s500_s4  ;;  %v239_v42 = vsel %vm237_vm11, %v686_v29, %v233_v40  ;;  %v241_v43 = vsel %vm240_vm12, %v686_v29, %v235_v41  ;;  %vm161_vm10 = vcmask 97280  }
  0x20   :  { %v690_v31 = vstv %s501_s5  ;;  %v245_v44 = vsel %vm243_vm13, %v688_v30, %v239_v42  ;;  %v247_v45 = vsel %vm246_vm14, %v688_v30, %v241_v43 }
  0x21   :  { %v251_v46 = vsel %vm249_vm15, %v690_v31, %v245_v44  ;;  %v708_v47 = vsel %vm252_vm1, %v690_v31, %v247_v45 }
  0x22   :  { %vm254_vm3 = vcmp.eq.s32.totalorder %v251_v46, %v708_v47 }
  0x23   :  { %vm257_vm5 = vmxor %vm254_vm3, %vm638_vm4 }
  0x24   :  { %vm711_vm7 = vmand %vm257_vm5, %vm255_vm2  ;;  %vm344_vm5 = vcmp.ne.s32.totalorder %v708_v47, %v676_v22 }
  0x25   :  { %v503_v50 = vsel %vm711_vm7, 1.0, %v639_v49  ;;  %vm718_vm8 = vmand %vm254_vm3, %vm255_vm2 }
  0x26   :  { %v274_v52 = vsel %vm261_vm6, %v503_v50, 0.0  ;;  %v502_v53 = vsel %vm718_vm8, 1.0, %v639_v49 }
  0x27   :  { %275 = vadd.xlane.f32.xlu1 %v274_v52  ;;  %v262_v54 = vsel %vm261_vm6, %v502_v53, 0.0 }
  0x98   :  { %v87_v12 = vpop.f32.mrf.mxu0  ;;  %v107_v13 = vpop.f32.mrf.mxu1 }
  0x99   :  { %v108_v14 = vadd.f32 %v107_v13, %v87_v12 }
  0x9a   :  { %v276_v61 = vpop.xlane.xlu1 %275 }
  0x9b   :  { %v277_v63 = vrot.slane %v276_v61, 4 }
  0x9d   :  { %v127_v15 = vpop.f32.mrf.mxu2  ;;  %v147_v16 = vpop.f32.mrf.mxu3  ;;  %v278_v1 = vadd.f32 %v277_v63, %v276_v61 }
  0x9e   :  { %v128_v17 = vadd.f32 %v127_v15, %v108_v14 }
  0x9f   :  { %v279_v5 = vrot.slane %v278_v1, 2 }
  0xa0   :  { %v671_v18 = vadd.f32 %v147_v16, %v128_v17 }
  0xa1   :  { %v280_v9 = vadd.f32 %v279_v5, %v278_v1 }
  0xa2   :  { %v150_v19 = vmul.f32 %v671_v18, %v671_v18  ;;  %v158_v55 = vmul.f32 -2.0, %v671_v18 }
  0xa3   :  { %v281_v11 = vrot.slane %v280_v9, 1 }
  0xa4   :  { %v152_v20 = vsel %vm151_vm0, %v150_v19, 0.0  ;;  %v159_v57 = vsel %vm151_vm0, %v158_v55, 1.0 }
  0xa5   :  { %153 = vadd.xlane.f32.xlu0 %v152_v20  ;;  %v282_v13 = vadd.f32 %v281_v11, %v280_v9 }
  0xad   :  { %263 = vadd.xlane.f32.xlu0 %v262_v54 }
 0x118   :  { %v154_v56 = vpop.xlane.xlu0 %153 }
 0x119   :  { %v155_v58 = vsel %vm151_vm0, %v671_v18, %v154_v56  ;;  %v160_v59 = vsel %vm156_vm9, %v159_v57, %v154_v56 }
 0x11a   :  { %493 = vmatpush.xpose.msk.msrb.mxu0 %vm161_vm10, %v160_v59  ;;  %v157_v60 = vsel %vm156_vm9, %v155_v58, 1.0  ;;  %vm357_vm9 = vcmp.ne.s32.totalorder %v708_v47, %v678_v23 }
 0x11d   :  { %494 = vmatmul.msk.f32.vlgmr.msrb.gmra.mxu0 %vm161_vm10, %v157_v60 }
 0x120   :  { %v264_v62 = vpop.xlane.xlu0 %263 }
 0x121   :  { %v265_v0 = vrot.slane %v264_v62, 4 }
 0x123   :  { %v266_v2 = vadd.f32 %v265_v0, %v264_v62 }
 0x125   :  { %v267_v6 = vrot.slane %v266_v2, 2 }
 0x127   :  { %v268_v8 = vadd.f32 %v267_v6, %v266_v2 }
 0x129   :  { %v269_v10 = vrot.slane %v268_v8, 1 }
 0x12b   :  { %v270_v12 = vadd.f32 %v269_v10, %v268_v8 }
 0x12d   :  { %512 = vpush %v270_v12 }
 0x12e   :  { %514 = vpush %v282_v13 }
 0x15e   :  { %s513_s6 = spop %512 }
 0x15f   :  { %s515_s7 = spop %514  ;;  %v295_v36 = vstv %s513_s6 }
 0x160   :  { %v323_v37 = vstv %s515_s7  ;;  %vm301_vm12 = vweird.f32 %v295_v36  ;;  %v307_v57 = vand.u32 2147483648, %v295_v36  ;;  %v305_v59 = vand.u32 2147483647, %v295_v36 }
 0x161   :  { %vm329_vm14 = vweird.f32 %v323_v37  ;;  %v335_v63 = vand.u32 2147483648, %v323_v37  ;;  %v333_v1 = vand.u32 2147483647, %v323_v37 }
 0x162   :  { %vm306_vm3 = vcmp.eq.f32.partialorder %v305_v59, 8.507059e+37 }
 0x163   :  { %v336_v8 = vor.u32 1.1754944e-38, %v335_v63  ;;  %vm334_vm4 = vcmp.eq.f32.partialorder %v333_v1, 8.507059e+37 }
 0x19a   :  { %v185_v3 = vpop.f32.mrf.mxu0 }
 0x19b   :  { %v188_v4 = vmax.f32 %v185_v3, 0.0  ;;  %v308_v3 = vor.u32 1.1754944e-38, %v307_v57 }
 0x19d   :  { %v189_v7 = vadd.f32 1e-16, %v188_v4 }
 0x19f   :  { %533 = vrsqrt.f32 %v189_v7  ;;  %vm197_vm0 = vcmp.eq.f32.partialorder %v189_v7, inf  ;;  %v200_v21 = vand.u32 2147483648, %v189_v7  ;;  %vm199_vm11 = vcmp.eq.f32.partialorder %v189_v7, 0.0 }
 0x1a0   :  { %535 = vrcp.f32 %v295_v36 }
 0x1a1   :  { %537 = vrcp.f32 %v323_v37 }
 0x1a5   :  { %v534_v14 = vpop.eup %533 }
 0x1a6   :  { %v191_v15 = vmul.f32 %v534_v14, %v189_v7  ;;  %v536_v38 = vpop.eup %535 }
 0x1a7   :  { %v538_v39 = vpop.eup %537  ;;  %v297_v40 = vmul.f32 %v536_v38, %v295_v36  ;;  %vm302_vm13 = vweird.f32 %v536_v38 }
 0x1a8   :  { %v192_v16 = vmul.f32 %v534_v14, %v191_v15  ;;  %v325_v41 = vmul.f32 %v538_v39, %v323_v37  ;;  %vm330_vm15 = vweird.f32 %v538_v39  ;;  %vm741_vm1 = vmor %vm301_vm12, %vm302_vm13  ;;  %vm369_vm12 = vcmp.ne.s32.totalorder %v708_v47, %v680_v26 }
 0x1a9   :  { %v298_v42 = vsub.f32 1.0, %v297_v40  ;;  %vm331_vm2 = vmor %vm329_vm14, %vm330_vm15 }
 0x1aa   :  { %v193_v17 = vmul.f32 0.5, %v192_v16  ;;  %v326_v43 = vsub.f32 1.0, %v325_v41 }
 0x1ab   :  { %v299_v50 = vmul.f32 %v536_v38, %v298_v42 }
 0x1ac   :  { %v194_v18 = vsub.f32 1.5, %v193_v17  ;;  %v327_v54 = vmul.f32 %v538_v39, %v326_v43 }
 0x1ad   :  { %v300_v58 = vadd.f32 %v536_v38, %v299_v50 }
 0x1ae   :  { %v195_v19 = vmul.f32 %v534_v14, %v194_v18  ;;  %v328_v0 = vadd.f32 %v538_v39, %v327_v54 }
 0x1af   :  { %v304_v5 = vsel %vm741_vm1, %v536_v38, %v300_v58  ;;  %vm381_vm1 = vcmp.ne.s32.totalorder %v708_v47, %v682_v27 }
 0x1b0   :  { %v196_v20 = vmul.f32 %v195_v19, %v189_v7  ;;  %v332_v9 = vsel %vm331_vm2, %v538_v39, %v328_v0  ;;  %v309_v10 = vsel %vm306_vm3, %v308_v3, %v304_v5 }
 0x1b1   :  { %v337_v11 = vsel %vm334_vm4, %v336_v8, %v332_v9 }
 0x1b2   :  { %v198_v24 = vsel %vm197_vm0, %v189_v7, %v196_v20 }
 0x1b3   :  { %v731_v25 = vsel %vm199_vm11, %v200_v21, %v198_v24 }
 0x1b4   :  { %v312_v32 = vsel %vm711_vm7, %v731_v25, 0.0  ;;  %v284_v33 = vsel %vm718_vm8, %v731_v25, 0.0  ;;  %v342_v12 = vperm.slane %v731_v25, 0  ;;  %v355_v13 = vperm.slane %v731_v25, 1 }
 0x1b5   :  { %v313_v34 = vsel %vm261_vm6, %v312_v32, 0.0  ;;  %v285_v35 = vsel %vm261_vm6, %v284_v33, 0.0  ;;  %v367_v14 = vperm.slane %v731_v25, 2  ;;  %v379_v17 = vperm.slane %v731_v25, 3 }
 0x1b6   :  { %314 = vadd.xlane.f32.xlu2 %v313_v34  ;;  %286 = vadd.xlane.f32.xlu1 %v285_v35  ;;  %v343_v15 = vsub.f32 %v342_v12, %v731_v25  ;;  %v356_v16 = vsub.f32 %v355_v13, %v731_v25  ;;  %v391_v19 = vperm.slane %v731_v25, 4  ;;  %v403_v22 = vperm.slane %v731_v25, 5 }
 0x1b7   :  { %v368_v20 = vsub.f32 %v367_v14, %v731_v25  ;;  %v380_v24 = vsub.f32 %v379_v17, %v731_v25  ;;  %v415_v32 = vperm.slane %v731_v25, 6  ;;  %v427_v35 = vperm.slane %v731_v25, 7 }
 0x1b8   :  { %v349_v21 = vmax.f32 %v343_v15, 0.0  ;;  %v361_v34 = vmax.f32 %v356_v16, 0.0  ;;  %v392_v26 = vsub.f32 %v391_v19, %v731_v25  ;;  %v404_v37 = vsub.f32 %v403_v22, %v731_v25 }
 0x1b9   :  { %v373_v39 = vmax.f32 %v368_v20, 0.0  ;;  %v416_v43 = vsub.f32 %v415_v32, %v731_v25  ;;  %v428_v27 = vsub.f32 %v427_v35, %v731_v25 }
 0x1bb   :  { %v421_v59 = vmax.f32 %v416_v43, 0.0  ;;  %v433_v0 = vmax.f32 %v428_v27, 0.0 }
 0x229   :  { %v315_v44 = vpop.xlane.xlu2 %314  ;;  %v287_v45 = vpop.xlane.xlu1 %286 }
 0x22a   :  { %v316_v46 = vrot.slane %v315_v44, 4  ;;  %v288_v48 = vrot.slane %v287_v45, 4 }
 0x22c   :  { %v317_v52 = vadd.f32 %v316_v46, %v315_v44  ;;  %v289_v53 = vadd.f32 %v288_v48, %v287_v45  ;;  %v385_v45 = vmax.f32 %v380_v24, 0.0 }
 0x22e   :  { %v318_v55 = vrot.slane %v317_v52, 2  ;;  %v290_v56 = vrot.slane %v289_v53, 2 }
 0x230   :  { %v291_v60 = vadd.f32 %v290_v56, %v289_v53  ;;  %v319_v62 = vadd.f32 %v318_v55, %v317_v52  ;;  %v397_v52 = vmax.f32 %v392_v26, 0.0  ;;  %v409_v56 = vmax.f32 %v404_v37, 0.0 }
 0x232   :  { %v292_v2 = vrot.slane %v291_v60, 1  ;;  %v320_v4 = vrot.slane %v319_v62, 1 }
 0x234   :  { %v293_v6 = vadd.f32 %v292_v2, %v291_v60  ;;  %v321_v7 = vadd.f32 %v320_v4, %v319_v62 }
 0x236   :  { %516 = vpush %v293_v6 }
 0x237   :  { %518 = vpush %v309_v10 }
 0x238   :  { %520 = vpush %v321_v7 }
 0x239   :  { %522 = vpush %v337_v11 }
 0x267   :  { %s517_s8 = spop %516 }
 0x268   :  { %s519_s9 = spop %518 }
 0x269   :  { %s311_s10 = smul.f32 %s519_s9, %s517_s8  ;;  %s521_s11 = spop %520 }
 0x26a   :  { %s523_s12 = spop %522 }
 0x26b   :  { %s339_s13 = smul.f32 %s523_s12, %s521_s11 }
 0x26d   :  { %s340_s14 = ssub.f32 %s339_s13, %s311_s10 }
 0x26f   :  { %s341_s16 = smax.f32 %s640_s15, %s340_s14 }
 0x270   :  { %v755_v18 = vstv %s341_s16 }
 0x271   :  { %vm346_vm7 = vcmp.lt.f32.partialorder %v343_v15, %v755_v18  ;;  %vm358_vm10 = vcmp.lt.f32.partialorder %v356_v16, %v755_v18  ;;  %vm370_vm13 = vcmp.lt.f32.partialorder %v368_v20, %v755_v18  ;;  %vm382_vm2 = vcmp.lt.f32.partialorder %v380_v24, %v755_v18 }
 0x272   :  { %vm347_vm0 = vmand %vm344_vm5, %vm346_vm7  ;;  %vm393_vm5 = vcmp.ne.s32.totalorder %v708_v47, %v684_v28  ;;  %vm394_vm7 = vcmp.lt.f32.partialorder %v392_v26, %v755_v18 }
 0x273   :  { %vm348_vm11 = vmand %vm718_vm8, %vm347_vm0  ;;  %vm405_vm0 = vcmp.ne.s32.totalorder %v708_v47, %v686_v29 }
 0x274   :  { %v504_v23 = vsel %vm348_vm11, 1.0, %v639_v49  ;;  %vm359_vm14 = vmand %vm357_vm9, %vm358_vm10  ;;  %v350_v33 = vsel %vm348_vm11, %v349_v21, 0.0  ;;  %vm406_vm11 = vcmp.lt.f32.partialorder %v404_v37, %v755_v18 }
 0x275   :  { %vm360_vm15 = vmand %vm718_vm8, %vm359_vm14  ;;  %vm417_vm14 = vcmp.ne.s32.totalorder %v708_v47, %v688_v30 }
 0x276   :  { %v505_v36 = vsel %vm360_vm15, 1.0, %v639_v49  ;;  %vm371_vm3 = vmand %vm369_vm12, %vm370_vm13  ;;  %v362_v38 = vsel %vm360_vm15, %v361_v34, 0.0  ;;  %vm418_vm15 = vcmp.lt.f32.partialorder %v416_v43, %v755_v18 }
 0x277   :  { %v366_v40 = vadd.f32 %v505_v36, %v504_v23  ;;  %vm372_vm4 = vmand %vm718_vm8, %vm371_vm3  ;;  %v363_v41 = vadd.f32 %v362_v38, %v350_v33  ;;  %vm429_vm3 = vcmp.ne.s32.totalorder %v708_v47, %v690_v31 }
 0x278   :  { %v506_v42 = vsel %vm372_vm4, 1.0, %v639_v49  ;;  %vm383_vm9 = vmand %vm381_vm1, %vm382_vm2  ;;  %v374_v44 = vsel %vm372_vm4, %v373_v39, 0.0  ;;  %vm430_vm4 = vcmp.lt.f32.partialorder %v428_v27, %v755_v18 }
 0x279   :  { %v378_v46 = vadd.f32 %v506_v42, %v366_v40  ;;  %vm384_vm10 = vmand %vm718_vm8, %vm383_vm9  ;;  %v375_v28 = vadd.f32 %v374_v44, %v363_v41 }
 0x27a   :  { %v507_v48 = vsel %vm384_vm10, 1.0, %v639_v49  ;;  %vm395_vm12 = vmand %vm393_vm5, %vm394_vm7  ;;  %v386_v50 = vsel %vm384_vm10, %v385_v45, 0.0 }
 0x27b   :  { %v390_v53 = vadd.f32 %v507_v48, %v378_v46  ;;  %vm396_vm13 = vmand %vm718_vm8, %vm395_vm12  ;;  %v387_v29 = vadd.f32 %v386_v50, %v375_v28  ;;  %vm472_vm12 = vcmask 0  }
 0x27c   :  { %v508_v54 = vsel %vm396_vm13, 1.0, %v639_v49  ;;  %vm407_vm1 = vmand %vm405_vm0, %vm406_vm11  ;;  %v398_v55 = vsel %vm396_vm13, %v397_v52, 0.0 }
 0x27d   :  { %v402_v57 = vadd.f32 %v508_v54, %v390_v53  ;;  %vm408_vm2 = vmand %vm718_vm8, %vm407_vm1  ;;  %v399_v25 = vadd.f32 %v398_v55, %v387_v29 }
 0x27e   :  { %v509_v30 = vsel %vm408_vm2, 1.0, %v639_v49  ;;  %vm419_vm5 = vmand %vm417_vm14, %vm418_vm15  ;;  %v410_v58 = vsel %vm408_vm2, %v409_v56, 0.0 }
 0x27f   :  { %v414_v60 = vadd.f32 %v509_v30, %v402_v57  ;;  %vm420_vm7 = vmand %vm718_vm8, %vm419_vm5  ;;  %v411_v61 = vadd.f32 %v410_v58, %v399_v25 }
 0x280   :  { %v510_v62 = vsel %vm420_vm7, 1.0, %v639_v49  ;;  %vm431_vm9 = vmand %vm429_vm3, %vm430_vm4  ;;  %v422_v63 = vsel %vm420_vm7, %v421_v59, 0.0 }
 0x281   :  { %v426_v1 = vadd.f32 %v510_v62, %v414_v60  ;;  %vm432_vm10 = vmand %vm718_vm8, %vm431_vm9  ;;  %v423_v31 = vadd.f32 %v422_v63, %v411_v61 }
 0x282   :  { %v511_v47 = vsel %vm432_vm10, 1.0, %v639_v49  ;;  %v434_v2 = vsel %vm432_vm10, %v433_v0, 0.0 }
 0x283   :  { %v438_v3 = vadd.f32 %v511_v47, %v426_v1  ;;  %v435_v4 = vadd.f32 %v434_v2, %v423_v31 }
 0x285   :  { %v448_v5 = vsel %vm261_vm6, %v438_v3, 0.0  ;;  %v439_v6 = vsel %vm261_vm6, %v435_v4, 0.0 }
 0x286   :  { %449 = vadd.xlane.f32.xlu2 %v448_v5  ;;  %440 = vadd.xlane.f32.xlu0 %v439_v6 }
 0x2f9   :  { %v450_v7 = vpop.xlane.xlu2 %449  ;;  %v441_v11 = vpop.xlane.xlu0 %440 }
 0x2fa   :  { %v451_v8 = vrot.slane %v450_v7, 4  ;;  %v442_v51 = vrot.slane %v441_v11, 4 }
 0x2fc   :  { %v452_v9 = vadd.f32 %v451_v8, %v450_v7  ;;  %v443_v15 = vadd.f32 %v442_v51, %v441_v11 }
 0x2fe   :  { %v453_v10 = vrot.slane %v452_v9, 2  ;;  %v444_v49 = vrot.slane %v443_v15, 2 }
 0x300   :  { %v454_v12 = vadd.f32 %v453_v10, %v452_v9  ;;  %v445_v17 = vadd.f32 %v444_v49, %v443_v15 }
 0x302   :  { %v455_v13 = vrot.slane %v454_v12, 1  ;;  %v446_v22 = vrot.slane %v445_v17, 1 }
 0x304   :  { %v456_v14 = vadd.f32 %v455_v13, %v454_v12  ;;  %v447_v33 = vadd.f32 %v446_v22, %v445_v17 }
 0x306   :  { %539 = vrcp.f32 %v456_v14  ;;  %v468_v20 = vand.u32 2147483648, %v456_v14  ;;  %v466_v24 = vand.u32 2147483647, %v456_v14  ;;  %vm462_vm8 = vweird.f32 %v456_v14 }
 0x308   :  { %v469_v32 = vor.u32 1.1754944e-38, %v468_v20  ;;  %vm467_vm11 = vcmp.eq.f32.partialorder %v466_v24, 8.507059e+37 }
 0x30c   :  { %v540_v16 = vpop.eup %539 }
 0x30d   :  { %v458_v18 = vmul.f32 %v540_v16, %v456_v14  ;;  %vm463_vm6 = vweird.f32 %v540_v16 }
 0x30e   :  { %vm464_vm0 = vmor %vm462_vm8, %vm463_vm6 }
 0x30f   :  { %v459_v19 = vsub.f32 1.0, %v458_v18 }
 0x311   :  { %v460_v21 = vmul.f32 %v540_v16, %v459_v19 }
 0x313   :  { %v461_v23 = vadd.f32 %v540_v16, %v460_v21 }
 0x315   :  { %v465_v34 = vsel %vm464_vm0, %v540_v16, %v461_v23 }
 0x316   :  { %v470_v26 = vsel %vm467_vm11, %v469_v32, %v465_v34 }
 0x317   :  { %v471_v35 = vmul.f32 %v470_v26, %v447_v33 }
 0x319   :  { %473 = vst.msk [vmem:[#allocation9] sm:$0x1] %vm472_vm12, %v471_v35 }
 0x31a   :  { %484 = dma.vmem_to_hbm [thread:$0]  %s480_s18, 16, %s482_s21, [#allocation4]  }
 0x31b   :  { %631 = dma.done.wait [#allocation4], 16  }
 0x31c   :  { %632 = vsyncadd [#allocation4], 4294967280 }
 0x31d   :  { %489 = vsyncpa [#allocation3], 1 }
 0x31e   :  { %490 = vsyncpa [#allocation7], 1 }
 0x31f   :  { %491 = vsyncpa [#allocation4], 1 }
 0x320   :  { %492 = vsyncpa [#allocation5], 1 }

</bundles_post_ra>
